<compile_context>
chip_gen: v7x
topology: tpu7x:2x2x1
jax: 0.10.0
libtpu: 0.0.40
codegen_flags: <defaults>
</compile_context>

<pallas_src>
import jax
import jax.numpy as jnp
from jax.experimental import pallas as pl
from jax.experimental.pallas import tpu as pltpu

IN_F, HID_F, OUT_F = 8, 6, 4
MAX_TILE_B = 65536  # multiple of 128; ~6 MiB double-buffered VMEM, fits every generation


def _cdiv(a: int, b: int) -> int:
    return (a + b - 1) // b


def _round_up(n: int, m: int) -> int:
    return _cdiv(n, m) * m


def _choose_tiling(B: int, max_tile_b: int):
    """Pad only to a 128 multiple, size tiles adaptively, prefer >=2 grid steps."""
    bp128 = _round_up(max(B, 1), 128)
    n = _cdiv(bp128, max_tile_b)
    if n < 2 and bp128 >= 256:
        n = 2  # lets dimension_semantics=("parallel",) use both v7x TensorCores
    tile_b = _round_up(_cdiv(bp128, n), 128)
    bp = n * tile_b
    return tile_b, bp, n


def fcnn_kernel(x_ref, w1_ref, b1_ref, w2_ref, b2_ref, o_ref):
    # x_ref: (8, T)  w1_ref: (6, 8)  b1_ref: (6, 1)  w2_ref: (4, 6)  b2_ref: (4, 1)
    # o_ref: (4, T)
    x = x_ref[...]                                        # (8, T) f32, batch on lanes

    # fc1 + ReLU on the MXU: (6,8) @ (8,T) -> (6,T)
    h = jnp.dot(w1_ref[...], x,
                preferred_element_type=jnp.float32,
                precision=jax.lax.Precision.HIGHEST) + b1_ref[...]
    h = jnp.maximum(h, 0.0)

    # fc2 on the MXU: (4,6) @ (6,T) -> (4,T)
    y = jnp.dot(w2_ref[...], h,
                preferred_element_type=jnp.float32,
                precision=jax.lax.Precision.HIGHEST) + b2_ref[...]
    o_ref[...] = y.astype(o_ref.dtype)


def fcnn_forward(x, w1, b1, w2, b2, *, max_tile_b=MAX_TILE_B):
    """x: (B, 8). Weights in PyTorch nn.Linear convention: w1 (6, 8), w2 (4, 6)."""
    B = x.shape[0]
    tile_b, Bp, n_tiles = _choose_tiling(B, max_tile_b)

    # lane-dense layout: batch on the lane axis, zero-pad the tail tile
    xt = jnp.pad(x.T, ((0, 0), (0, Bp - B)))              # (8, Bp)
    b1_col = b1.reshape(HID_F, 1)
    b2_col = b2.reshape(OUT_F, 1)

    flops = 2 * Bp * (IN_F * HID_F + HID_F * OUT_F)
    bytes_accessed = 4 * (Bp * (IN_F + OUT_F)
                          + IN_F * HID_F + HID_F * OUT_F + HID_F + OUT_F)

    y_t = pl.pallas_call(
        fcnn_kernel,
        out_shape=jax.ShapeDtypeStruct((OUT_F, Bp), x.dtype),
        grid=(n_tiles,),
        in_specs=[
            pl.BlockSpec((IN_F, tile_b), lambda i: (0, i)),     # x: streams over batch
            pl.BlockSpec((HID_F, IN_F), lambda i: (0, 0)),      # weights: VMEM-resident
            pl.BlockSpec((HID_F, 1), lambda i: (0, 0)),
            pl.BlockSpec((OUT_F, HID_F), lambda i: (0, 0)),
            pl.BlockSpec((OUT_F, 1), lambda i: (0, 0)),
        ],
        out_specs=pl.BlockSpec((OUT_F, tile_b), lambda i: (0, i)),
        compiler_params=pltpu.CompilerParams(
            dimension_semantics=("parallel",),                  # megacore sharding on v7x
        ),
        cost_estimate=pl.CostEstimate(
            flops=flops, transcendentals=0, bytes_accessed=bytes_accessed),
    )(xt, w1, b1_col, w2, b2_col)

    # slice dead pad columns off BEFORE the transpose (cheaper relayout)
    return y_t[:, :B].T                                         # (B, 4)


def init_params(key):
    """nn.Linear-style init: U(-1/sqrt(fan_in), 1/sqrt(fan_in)); weights stored (out, in)."""
    k1, k2, k3, k4 = jax.random.split(key, 4)
    bound1 = 1.0 / jnp.sqrt(float(IN_F))
    bound2 = 1.0 / jnp.sqrt(float(HID_F))
    w1 = jax.random.uniform(k1, (HID_F, IN_F), jnp.float32, -bound1, bound1)
    b1 = jax.random.uniform(k2, (HID_F,), jnp.float32, -bound1, bound1)
    w2 = jax.random.uniform(k3, (OUT_F, HID_F), jnp.float32, -bound2, bound2)
    b2 = jax.random.uniform(k4, (OUT_F,), jnp.float32, -bound2, bound2)
    return w1, b1, w2, b2


if __name__ == "__main__":
    key = jax.random.PRNGKey(0)
    kx, kp = jax.random.split(key)
    B = 4  # small demo batch; wrapper pads to a 128-multiple lane tile and slices back
    x = jax.random.normal(kx, (B, IN_F), jnp.float32)
    w1, b1, w2, b2 = init_params(kp)

    out = fcnn_forward(x, w1, b1, w2, b2)
    out = jax.block_until_ready(out)

    # reference (same math as the PyTorch module: y = relu(x @ W1.T + b1) @ W2.T + b2)
    ref = jnp.maximum(x @ w1.T + b1, 0.0) @ w2.T + b2
    assert out.shape == (B, OUT_F)
    assert jnp.allclose(out, ref, atol=1e-5, rtol=1e-5)
    print("KERNEL_OK")
</pallas_src>

<mosaic_0001>
module attributes {stable_mosaic.version = 11 : i64} {
  func.func @fcnn_kernel(%arg0: i32, %arg1: memref<8x128xf32, #tpu.memory_space<vmem>>, %arg2: memref<6x8xf32, #tpu.memory_space<vmem>>, %arg3: memref<6x1xf32, #tpu.memory_space<vmem>>, %arg4: memref<4x6xf32, #tpu.memory_space<vmem>>, %arg5: memref<4x1xf32, #tpu.memory_space<vmem>>, %arg6: memref<4x128xf32, #tpu.memory_space<vmem>>) attributes {dimension_semantics = [#tpu.dimension_semantics<parallel>], iteration_bounds = array<i64: 1>, scalar_prefetch = 0 : i64, scratch_operands = 0 : i64, tpu.core_type = #tpu.core_type<tc>, window_params = [{transform_indices = @transform_0, window_bounds = array<i64: 8, 128>}, {pipeline_mode = #tpu.pipeline_mode<synchronous>, transform_indices = @transform_1, window_bounds = array<i64: 6, 8>}, {pipeline_mode = #tpu.pipeline_mode<synchronous>, transform_indices = @transform_2, window_bounds = array<i64: 6, 1>}, {pipeline_mode = #tpu.pipeline_mode<synchronous>, transform_indices = @transform_3, window_bounds = array<i64: 4, 6>}, {pipeline_mode = #tpu.pipeline_mode<synchronous>, transform_indices = @transform_4, window_bounds = array<i64: 4, 1>}, {transform_indices = @transform_5, window_bounds = array<i64: 4, 128>}]} {
    %c0 = arith.constant 0 : index
    %c0_0 = arith.constant 0 : index
    %0 = vector.load %arg1[%c0, %c0_0] : memref<8x128xf32, #tpu.memory_space<vmem>>, vector<8x128xf32>
    %c0_1 = arith.constant 0 : index
    %c0_2 = arith.constant 0 : index
    %1 = vector.load %arg2[%c0_1, %c0_2] : memref<6x8xf32, #tpu.memory_space<vmem>>, vector<6x8xf32>
    %cst = arith.constant dense<0.000000e+00> : vector<6x128xf32>
    %2 = tpu.matmul %1, %0, %cst {dimension_numbers = #tpu.dot_dimension_numbers<[1], [0], [0], [1], [0, 0, 1, 1], [], []>, precision = #tpu.contract_precision<fp32>} : vector<6x8xf32>, vector<8x128xf32>, vector<6x128xf32> -> vector<6x128xf32>
    %c0_3 = arith.constant 0 : index
    %c0_4 = arith.constant 0 : index
    %3 = vector.load %arg3[%c0_3, %c0_4] : memref<6x1xf32, #tpu.memory_space<vmem>>, vector<6x1xf32>
    %4 = vector.broadcast %3 : vector<6x1xf32> to vector<6x128xf32>
    %5 = arith.addf %2, %4 : vector<6x128xf32>
    %cst_5 = arith.constant 0.000000e+00 : f32
    %6 = vector.broadcast %cst_5 : f32 to vector<6x128xf32>
    %7 = arith.maximumf %5, %6 : vector<6x128xf32>
    %c0_6 = arith.constant 0 : index
    %c0_7 = arith.constant 0 : index
    %8 = vector.load %arg4[%c0_6, %c0_7] : memref<4x6xf32, #tpu.memory_space<vmem>>, vector<4x6xf32>
    %cst_8 = arith.constant dense<0.000000e+00> : vector<4x128xf32>
    %9 = tpu.matmul %8, %7, %cst_8 {dimension_numbers = #tpu.dot_dimension_numbers<[1], [0], [0], [1], [0, 0, 1, 1], [], []>, precision = #tpu.contract_precision<fp32>} : vector<4x6xf32>, vector<6x128xf32>, vector<4x128xf32> -> vector<4x128xf32>
    %c0_9 = arith.constant 0 : index
    %c0_10 = arith.constant 0 : index
    %10 = vector.load %arg5[%c0_9, %c0_10] : memref<4x1xf32, #tpu.memory_space<vmem>>, vector<4x1xf32>
    %11 = vector.broadcast %10 : vector<4x1xf32> to vector<4x128xf32>
    %12 = arith.addf %9, %11 : vector<4x128xf32>
    %c0_11 = arith.constant 0 : index
    %c0_12 = arith.constant 0 : index
    %13 = vector.load %arg6[%c0_11, %c0_12] : memref<4x128xf32, #tpu.memory_space<vmem>>, vector<4x128xf32>
    tpu.vector_store %arg6[%c0_11, %c0_12], %12 {strides = array<i32>} : memref<4x128xf32, #tpu.memory_space<vmem>>, vector<4x128xf32>,
    return
  }
  func.func @transform_0(%arg0: i32) -> (i32, i32) {
    %c0_i32 = arith.constant 0 : i32
    %c0_i32_0 = arith.constant 0 : i32
    return %c0_i32, %arg0 : i32, i32
  }
  func.func @transform_1(%arg0: i32) -> (i32, i32) {
    %c0_i32 = arith.constant 0 : i32
    %c0_i32_0 = arith.constant 0 : i32
    %c0_i32_1 = arith.constant 0 : i32
    return %c0_i32, %c0_i32_0 : i32, i32
  }
  func.func @transform_2(%arg0: i32) -> (i32, i32) {
    %c0_i32 = arith.constant 0 : i32
    %c0_i32_0 = arith.constant 0 : i32
    %c0_i32_1 = arith.constant 0 : i32
    return %c0_i32, %c0_i32_0 : i32, i32
  }
  func.func @transform_3(%arg0: i32) -> (i32, i32) {
    %c0_i32 = arith.constant 0 : i32
    %c0_i32_0 = arith.constant 0 : i32
    %c0_i32_1 = arith.constant 0 : i32
    return %c0_i32, %c0_i32_0 : i32, i32
  }
  func.func @transform_4(%arg0: i32) -> (i32, i32) {
    %c0_i32 = arith.constant 0 : i32
    %c0_i32_0 = arith.constant 0 : i32
    %c0_i32_1 = arith.constant 0 : i32
    return %c0_i32, %c0_i32_0 : i32, i32
  }
  func.func @transform_5(%arg0: i32) -> (i32, i32) {
    %c0_i32 = arith.constant 0 : i32
    %c0_i32_0 = arith.constant 0 : i32
    return %c0_i32, %arg0 : i32, i32
  }
}

</mosaic_0001>

<bundles_post_ra>
// kernel: tpu_custom_call.1
= control target key start
LH: loop header
LB: loop body
LE: loop exit
PB: predicated region body
PF: predicated region fallthrough
CT: control target
= control target key end

     0   :  { %vm29_vm0 = vcmask 64512   ;;  %v1091_v2 = vmov 0.0   ;;  %vm1092_vm1 = vmmov 0   ;;  %v1093_v7 = vmov 0   ;;  %s1188_s0 = inlined_call_operand.vmem [shape: f32[8,128], index: 0, kind: input, shape index: {}]   ;;  %s1189_s1 = inlined_call_operand.vmem [shape: f32[6,8], index: 1, kind: input, shape index: {}]   ;;  %s1190_s2 = inlined_call_operand.vmem [shape: f32[6,1], index: 2, kind: input, shape index: {}]   ;;  %s1191_s3 = inlined_call_operand.vmem [shape: f32[4,6], index: 3, kind: input, shape index: {}]   ;;  %s1192_s4 = inlined_call_operand.vmem [shape: f32[4,1], index: 4, kind: input, shape index: {}]   ;;  %s1193_s5 = inlined_call_operand.hbm [shape: f32[4,128], index: 5, kind: output, shape index: {}]  }
   0x1   :  { %v21_v0 = vld [vmem:[%s1188_s0] sm:$0xff]  ;;  %980 = vmatprep.subr.mxu0 %v1091_v2  ;;  %982 = vmatprep.mubr.msk.f32.mxu0 %vm1092_vm1, %v1091_v2 }
   0x2   :  { %v22_v1 = vld [vmem:[%s1189_s1] sm:$0x3f]  ;;  %v34_v3 = vand.u32 4294901760, %v21_v0  ;;  %1066 = vset.pattern.permute.xlu0 %v1093_v7  ;;  %1010 = vmatprep.subr.mxu1 %v1091_v2 }
   0x3   :  { %v31_v4 = vsel %vm29_vm0, %v22_v1, 0  ;;  %v23_v5 = vld [vmem:[%s1190_s2] sm:$0x3f] }
   0x4   :  { %v99_v6 = vand.u32 4294901760, %v31_v4 }
   0x5   :  { %10 = vsyncpa [#allocation3], 0  ;;  %981 = vmatpush3.msra.mxu0 %v34_v3  ;;  %v111_v8 = vsub.f32 %v21_v0, %v34_v3  ;;  %26 = vperm.xlu0 %1066, %v23_v5   ;;  %v481_v10 = vld [vmem:[%s1192_s4] sm:$0xf]  ;;  %vm487_vm2 = vcmask 48128   ;;  %vm491_vm3 = vcmask 1045504  }
   0x6   :  { %v100_v9 = vsub.f32 %v31_v4, %v99_v6  ;;  %985 = vmatprep.subr.mxu0 %v1091_v2  ;;  %1012 = vmatprep.mubr.msk.f32.mxu1 %vm1092_vm1, %v1091_v2  ;;  %v480_v17 = vld [vmem:[%s1191_s3] sm:$0xf]  ;;  %s1094_s3 = smov [#allocation2]  }
   0x7   :  { %v112_v11 = vand.u32 4294901760, %v111_v8  ;;  %v489_v18 = vsel %vm487_vm2, %v480_v17, 0  ;;  %s948_s24 = sshll.u32 %s1094_s3, 4  ;;  %s949_s24 = int_to_ptr.vmem [resolvable:$true] %s948_s24 }
   0x8   :  { %v101_v12 = vand.u32 4294901760, %v100_v9  ;;  %v561_v19 = vand.u32 4294901760, %v489_v18  ;;  %s1067_s25 = scalar_lea.vmem %s949_s24, 64  ;;  %p1072_p1 = scmp.lt.s32.totalorder %s949_s24, %s949_s24 }
   0x9   :  { %v113_v13 = vsub.f32 %v111_v8, %v112_v11  ;;  %484 = vperm.xlu0 %1066, %v481_v10   ;;  %p1068_p0 = scmp.ne.s32.totalorder %s949_s24, %s1067_s25  ;;  %p1073_p2 = scmp.lt.s32.totalorder %s1067_s25, %s1067_s25 }
   0xa   :  { %v102_v14 = vsub.f32 %v100_v9, %v101_v12  ;;  %v562_v20 = vsub.f32 %v489_v18, %v561_v19 }
   0xb   :  { %v114_v15 = vand.u32 4294901760, %v113_v13  ;;  %p1074_p3 = por %p1073_p2, %p1072_p1 }
   0xc   :  { %v103_v16 = vand.u32 4294901760, %v102_v14  ;;  %v563_v21 = vand.u32 4294901760, %v562_v20 }
   0xd   :  { %p1075_p4 = pnand %p1074_p3, %p1068_p0 }
   0xe   :  { %983 = vmatmul.mubr.f32.vlgmr.msra.gmra.mrb[0].mxu0 %v103_v16  ;;  %v564_v26 = vsub.f32 %v562_v20, %v563_v21 }
   0xf   :  { %986 = vmatpush3.msra.mxu0 %v114_v15  ;;  %987 = vmatprep.mubr.msk.f32.mxu0 %vm1092_vm1, %v1091_v2 }
  0x10   :  { %990 = vmatprep.subr.mxu0 %v1091_v2  ;;  %v565_v29 = vand.u32 4294901760, %v564_v26 }
  0x16   :  { %988 = vmatmul.mubr.f32.vlgmr.msra.gmra.mrb[0].mxu0 %v99_v6 }
  0x17   :  { %991 = vmatpush3.msra.mxu0 %v111_v8  ;;  %992 = vmatprep.mubr.msk.f32.mxu0 %vm1092_vm1, %v1091_v2 }
  0x18   :  { %995 = vmatprep.subr.mxu0 %v1091_v2 }
  0x1e   :  { %993 = vmatmul.mubr.f32.vlgmr.msra.gmra.mrb[0].mxu0 %v100_v9 }
  0x1f   :  { %996 = vmatpush3.msra.mxu0 %v34_v3  ;;  %997 = vmatprep.mubr.msk.f32.mxu0 %vm1092_vm1, %v1091_v2 }
  0x20   :  { %1000 = vmatprep.subr.mxu0 %v1091_v2 }
  0x26   :  { %998 = vmatmul.mubr.f32.vlgmr.msra.gmra.mrb[0].mxu0 %v101_v12 }
  0x27   :  { %1001 = vmatpush3.msra.mxu0 %v112_v11  ;;  %1002 = vmatprep.mubr.msk.f32.mxu0 %vm1092_vm1, %v1091_v2 }
  0x28   :  { %1005 = vmatprep.subr.mxu0 %v1091_v2 }
  0x2e   :  { %1003 = vmatmul.mubr.f32.vlgmr.msra.gmra.mrb[0].mxu0 %v99_v6 }
  0x2f   :  { %1006 = vmatpush3.msra.mxu0 %v34_v3  ;;  %1007 = vmatprep.mubr.msk.f32.mxu0 %vm1092_vm1, %v1091_v2 }
  0x36   :  { %1008 = vmatmul.mubr.f32.vlgmr.msra.gmra.mrb[0].mxu0 %v99_v6 }
  0x84   :  { %v27_v22 = vpop.permute.xlu0 %26 }
  0x88   :  { %v485_v35 = vpop.permute.xlu0 %484 }
 0x109   :  { %v475_v23 = vpop.f32.mrb[0].mxu0 }
 0x10a   :  { %v1040_v24 = vadd.f32 %v475_v23, %v27_v22  ;;  %v1009_v25 = vpop.f32.mrb[1].mxu0 }
 0x10c   :  { %v479_v27 = vmax.f32 %v1040_v24, 0.0 }
 0x10e   :  { %v493_v28 = vsel %vm491_vm3, %v479_v27, 0 }
 0x10f   :  { %v496_v30 = vand.u32 4294901760, %v493_v28 }
 0x111   :  { %v573_v31 = vsub.f32 %v493_v28, %v496_v30  ;;  %1011 = vmatpush3.msra.mxu1 %v496_v30 }
 0x112   :  { %1013 = vmatmul.mubr.f32.vlgmr.msra.gmra.mrb[0].mxu1 %v565_v29  ;;  %1015 = vmatprep.subr.mxu1 %v1091_v2 }
 0x113   :  { %v574_v32 = vand.u32 4294901760, %v573_v31  ;;  %1017 = vmatprep.mubr.msk.f32.mxu1 %vm1092_vm1, %v1091_v2 }
 0x115   :  { %v575_v33 = vsub.f32 %v573_v31, %v574_v32 }
 0x117   :  { %v576_v34 = vand.u32 4294901760, %v575_v33 }
 0x119   :  { %1016 = vmatpush3.msra.mxu1 %v576_v34 }
 0x11a   :  { %1018 = vmatmul.mubr.f32.vlgmr.msra.gmra.mrb[0].mxu1 %v561_v19  ;;  %1020 = vmatprep.subr.mxu1 %v1091_v2 }
 0x11b   :  { %1021 = vmatpush3.msra.mxu1 %v573_v31  ;;  %1022 = vmatprep.mubr.msk.f32.mxu1 %vm1092_vm1, %v1091_v2 }
 0x11c   :  { %1025 = vmatprep.subr.mxu1 %v1091_v2 }
 0x122   :  { %1023 = vmatmul.mubr.f32.vlgmr.msra.gmra.mrb[0].mxu1 %v562_v20 }
 0x123   :  { %1026 = vmatpush3.msra.mxu1 %v496_v30  ;;  %1027 = vmatprep.mubr.msk.f32.mxu1 %vm1092_vm1, %v1091_v2 }
 0x124   :  { %1030 = vmatprep.subr.mxu1 %v1091_v2 }
 0x12a   :  { %1028 = vmatmul.mubr.f32.vlgmr.msra.gmra.mrb[0].mxu1 %v563_v21 }
 0x12b   :  { %1031 = vmatpush3.msra.mxu1 %v574_v32  ;;  %1032 = vmatprep.mubr.msk.f32.mxu1 %vm1092_vm1, %v1091_v2 }
 0x12c   :  { %1035 = vmatprep.subr.mxu1 %v1091_v2 }
 0x132   :  { %1033 = vmatmul.mubr.f32.vlgmr.msra.gmra.mrb[0].mxu1 %v561_v19 }
 0x133   :  { %1036 = vmatpush3.msra.mxu1 %v496_v30  ;;  %1037 = vmatprep.mubr.msk.f32.mxu1 %vm1092_vm1, %v1091_v2 }
 0x13a   :  { %1038 = vmatmul.mubr.f32.vlgmr.msra.gmra.mrb[0].mxu1 %v561_v19 }
 0x20d   :  { %v937_v36 = vpop.f32.mrb[0].mxu1 }
 0x20e   :  { %v1041_v37 = vadd.f32 %v937_v36, %v485_v35  ;;  %v1039_v38 = vpop.f32.mrb[1].mxu1 }
 0x210   :  { %941 = vst [vmem:[#allocation2] sm:$0xf] %v1041_v37 }
 0x211   :  { %1078 = shalt.err (!%p1075_p4)
}
 0x212   :  { %s1079_s28 = scalar_lea.hbm %s1193_s5, 64 }
 0x213   :  { %p1080_p5 = scmp.ne.s32.totalorder %s1193_s5, %s1079_s28  ;;  %p1083_p6 = scmp.lt.u32.totalorder %s1079_s28, %s1193_s5 }
 0x215   :  { %p1085_p7 = pnand %p1083_p6, %p1080_p5 }
 0x217   :  { %1088 = shalt.err (!%p1085_p7)
}
 0x218   :  { %951 = dma.vmem_to_hbm [thread:$0]  %s949_s24, 64, %s1193_s5, [#allocation3]  }
 0x219   :  { %1089 = dma.done.wait [#allocation3], 64  }
 0x21a   :  { %1090 = vsyncadd [#allocation3], 4294967232 }
 0x21b   :  { %955 = vsyncpa [#allocation3], 1 }

</bundles_post_ra>
